<compile_context>
chip_gen: v7x
topology: tpu7x:2x2x1
jax: 0.10.0
libtpu: 0.0.40
codegen_flags: <defaults>
</compile_context>

<pallas_src>
import jax
import jax.numpy as jnp
from jax.experimental import pallas as pl
from jax.experimental.pallas import tpu as pltpu  # noqa: F401 (kept for parity / future tiling)

# ----- synthetic cfg ---------------------------------------------------------
B, C_IN, H, W = 2, 4, 16, 16    # small NCHW input
C1 = 32                         # encoder out_size
HID = 64                        # head hidden width
EMB = 16                        # cfg.emb
BN_EPS = 1e-5

K_TAPS = 9 * C_IN               # im2col contraction width (36)
KP = 128                        # lane-padded contraction dim
C1P = 128                       # lane-padded encoder width
HIDP = 128                      # lane-padded head hidden width
EMBP = 128                      # lane-padded embedding width


# ----- Pallas kernel: conv (as one fused matmul) + pool + head, whole batch --
def base_method_kernel(patches_ref, wconv_ref, bconv_ref, w1_ref, b1_ref,
                       w2_ref, b2_ref, out_ref):
    # conv3x3 as a single MXU matmul over the fused tap/channel axis
    feat = jnp.dot(patches_ref[...], wconv_ref[...],
                   preferred_element_type=jnp.float32) + bconv_ref[...]
    feat = jnp.maximum(feat, 0.0)                                 # [B*H*W, C1P]

    # per-sample global average pooling (sublane-aligned split: H*W % 8 == 0)
    pooled = feat.reshape(B, H * W, C1P).sum(axis=1) * (1.0 / (H * W))  # [B, C1P]

    # head, batched over all samples: Linear (BN folded) -> ReLU -> Linear
    h = jnp.dot(pooled.astype(jnp.bfloat16), w1_ref[...],
                preferred_element_type=jnp.float32) + b1_ref[...]       # [B, HIDP]
    h = jnp.maximum(h, 0.0)
    out = jnp.dot(h.astype(jnp.bfloat16), w2_ref[...],
                  preferred_element_type=jnp.float32) + b2_ref[...]     # [B, EMBP]
    out_ref[...] = out


# ----- wrapper: layout + im2col glue, then one pallas_call --------------------
def build_patches(x_nchw):
    """NCHW f32 -> lane-dense bf16 im2col patches [B*H*W, KP]."""
    x = jnp.transpose(x_nchw, (0, 2, 3, 1)).astype(jnp.bfloat16)       # NHWC bf16
    xp = jnp.pad(x, ((0, 0), (1, 1), (1, 1), (0, 0)))                  # [B,H+2,W+2,C_IN]
    taps = []
    for t in range(9):
        ky, kx = divmod(t, 3)
        taps.append(xp[:, ky:ky + H, kx:kx + W, :])                    # [B,H,W,C_IN]
    patches = jnp.concatenate(taps, axis=-1)                           # [B,H,W,9*C_IN]
    patches = patches.reshape(B * H * W, K_TAPS)
    return jnp.pad(patches, ((0, 0), (0, KP - K_TAPS)))                # [B*H*W, KP]


def base_method_forward(x_nchw, params):
    """Runs head(model(x)). x_nchw: [B, C_IN, H, W] float32 -> [B, EMB] f32."""
    patches = build_patches(x_nchw)
    wconv, bconv, w1, b1, w2, b2 = params

    flops = (2 * (B * H * W) * KP * C1P
             + 2 * B * C1P * HIDP + 2 * B * HIDP * EMBP)
    bytes_accessed = (patches.size * 2 + wconv.size * 2 + w1.size * 2
                      + w2.size * 2
                      + (bconv.size + b1.size + b2.size) * 4
                      + B * EMBP * 4)

    out = pl.pallas_call(
        base_method_kernel,
        out_shape=jax.ShapeDtypeStruct((B, EMBP), jnp.float32),
        cost_estimate=pl.CostEstimate(
            flops=flops, transcendentals=0, bytes_accessed=bytes_accessed),
    )(patches, wconv, bconv, w1, b1, w2, b2)

    return out[:, :EMB]


# ----- deterministic parameter init (BN folded, channel dims zero-padded) ----
def init_params():
    key = jax.random.PRNGKey(0)
    ks = jax.random.split(key, 8)
    # conv weight in torch layout (Cout, Cin, 3, 3)
    wconv_t = 0.1 * jax.random.normal(ks[0], (C1, C_IN, 3, 3), jnp.float32)
    bconv = 0.01 * jax.random.normal(ks[1], (1, C1), jnp.float32)
    # head linear 1
    w1 = 0.1 * jax.random.normal(ks[2], (C1, HID), jnp.float32)
    b1 = 0.01 * jax.random.normal(ks[3], (1, HID), jnp.float32)
    # BatchNorm1d (eval mode) folded into linear 1
    gamma = 1.0 + 0.05 * jax.random.normal(ks[4], (1, HID), jnp.float32)
    beta = 0.05 * jax.random.normal(ks[5], (1, HID), jnp.float32)
    run_mean = 0.02 * jax.random.normal(ks[6], (1, HID), jnp.float32)
    run_var = jnp.ones((1, HID), jnp.float32)
    bn_scale = gamma / jnp.sqrt(run_var + BN_EPS)
    bn_shift = beta - run_mean * bn_scale
    w1f = w1 * bn_scale                       # scale output columns
    b1f = b1 * bn_scale + bn_shift
    # head linear 2
    w2 = 0.1 * jax.random.normal(ks[7], (HID, EMB), jnp.float32)
    b2 = jnp.zeros((1, EMB), jnp.float32)

    # fused conv weight: row index = tap*C_IN + c, tap t = ky*3 + kx, matching
    # torch Conv2d weight[o, c, ky, kx] against the 1-px padded input
    wconv_fused = jnp.transpose(wconv_t, (2, 3, 1, 0)).reshape(K_TAPS, C1)

    # zero-pad to lane-friendly widths (numerically inert) + bf16 weights
    wconv_p = jnp.zeros((KP, C1P), jnp.float32
                        ).at[:K_TAPS, :C1].set(wconv_fused).astype(jnp.bfloat16)
    bconv_p = jnp.zeros((1, C1P), jnp.float32).at[:, :C1].set(bconv)
    w1_p = jnp.zeros((C1P, HIDP), jnp.float32
                     ).at[:C1, :HID].set(w1f).astype(jnp.bfloat16)
    b1_p = jnp.zeros((1, HIDP), jnp.float32).at[:, :HID].set(b1f)
    w2_p = jnp.zeros((HIDP, EMBP), jnp.float32
                     ).at[:HID, :EMB].set(w2).astype(jnp.bfloat16)
    b2_p = jnp.zeros((1, EMBP), jnp.float32).at[:, :EMB].set(b2)
    return (wconv_p, bconv_p, w1_p, b1_p, w2_p, b2_p)


# ----- pure-JAX reference (same padded params, f32 math) ----------------------
def reference_forward(x_nchw, params):
    wconv, bconv, w1, b1, w2, b2 = params
    patches = build_patches(x_nchw).astype(jnp.float32)               # [B*H*W, KP]
    feat = jnp.maximum(patches @ wconv.astype(jnp.float32) + bconv, 0.0)
    pooled = feat.reshape(B, H * W, C1P).mean(axis=1)                 # [B, C1P]
    h = jnp.maximum(pooled @ w1.astype(jnp.float32) + b1, 0.0)        # [B, HIDP]
    out = h @ w2.astype(jnp.float32) + b2                             # [B, EMBP]
    return out[:, :EMB]


if __name__ == "__main__":
    key = jax.random.PRNGKey(0)
    x = jax.random.normal(key, (B, C_IN, H, W), jnp.float32)          # NCHW input
    params = init_params()

    out = jax.block_until_ready(base_method_forward(x, params))
    assert out.shape == (B, EMB)
    assert bool(jnp.all(jnp.isfinite(out)))

    ref = reference_forward(x, params)
    assert bool(jnp.allclose(out, ref, rtol=3e-2, atol=3e-2)), \
        float(jnp.max(jnp.abs(out - ref)))

    # TODO(synk): get_acc/eval_knn/eval_sgd2 (kNN + linear-probe evaluation
    # loops over datasets) are host-side evaluation utilities, not kernel compute.
    print("KERNEL_OK")
</pallas_src>

<mosaic_0001>
module attributes {stable_mosaic.version = 11 : i64} {
  func.func @base_method_kernel(%arg0: memref<512x128xbf16, #tpu.memory_space<vmem>>, %arg1: memref<128x128xbf16, #tpu.memory_space<vmem>>, %arg2: memref<1x128xf32, #tpu.memory_space<vmem>>, %arg3: memref<128x128xbf16, #tpu.memory_space<vmem>>, %arg4: memref<1x128xf32, #tpu.memory_space<vmem>>, %arg5: memref<128x128xbf16, #tpu.memory_space<vmem>>, %arg6: memref<1x128xf32, #tpu.memory_space<vmem>>, %arg7: memref<2x128xf32, #tpu.memory_space<vmem>>) attributes {dimension_semantics = [], scalar_prefetch = 0 : i64, scratch_operands = 0 : i64, tpu.core_type = #tpu.core_type<tc>} {
    %c0 = arith.constant 0 : index
    %c0_0 = arith.constant 0 : index
    %0 = vector.load %arg0[%c0, %c0_0] : memref<512x128xbf16, #tpu.memory_space<vmem>>, vector<512x128xbf16>
    %c0_1 = arith.constant 0 : index
    %c0_2 = arith.constant 0 : index
    %1 = vector.load %arg1[%c0_1, %c0_2] : memref<128x128xbf16, #tpu.memory_space<vmem>>, vector<128x128xbf16>
    %cst = arith.constant dense<0.000000e+00> : vector<512x128xf32>
    %2 = tpu.matmul %0, %1, %cst {dimension_numbers = #tpu.dot_dimension_numbers<[1], [0], [0], [1], [0, 0, 1, 1], [], []>} : vector<512x128xbf16>, vector<128x128xbf16>, vector<512x128xf32> -> vector<512x128xf32>
    %c0_3 = arith.constant 0 : index
    %c0_4 = arith.constant 0 : index
    %3 = vector.load %arg2[%c0_3, %c0_4] : memref<1x128xf32, #tpu.memory_space<vmem>>, vector<1x128xf32>
    %4 = vector.broadcast %3 : vector<1x128xf32> to vector<512x128xf32>
    %5 = arith.addf %2, %4 : vector<512x128xf32>
    %cst_5 = arith.constant 0.000000e+00 : f32
    %6 = vector.broadcast %cst_5 : f32 to vector<512x128xf32>
    %7 = arith.maximumf %5, %6 : vector<512x128xf32>
    %8 = vector.shape_cast %7 : vector<512x128xf32> to vector<2x256x128xf32>
    %cst_6 = arith.constant dense<0.000000e+00> : vector<2x128xf32>
    %9 = vector.multi_reduction <add>, %8, %cst_6 [1] : vector<2x256x128xf32> to vector<2x128xf32>
    %cst_7 = arith.constant 3.906250e-03 : f32
    %10 = vector.broadcast %cst_7 : f32 to vector<2x128xf32>
    %11 = arith.mulf %9, %10 : vector<2x128xf32>
    %12 = arith.truncf %11 : vector<2x128xf32> to vector<2x128xbf16>
    %c0_8 = arith.constant 0 : index
    %c0_9 = arith.constant 0 : index
    %13 = vector.load %arg3[%c0_8, %c0_9] : memref<128x128xbf16, #tpu.memory_space<vmem>>, vector<128x128xbf16>
    %cst_10 = arith.constant dense<0.000000e+00> : vector<2x128xf32>
    %14 = tpu.matmul %12, %13, %cst_10 {dimension_numbers = #tpu.dot_dimension_numbers<[1], [0], [0], [1], [0, 0, 1, 1], [], []>} : vector<2x128xbf16>, vector<128x128xbf16>, vector<2x128xf32> -> vector<2x128xf32>
    %c0_11 = arith.constant 0 : index
    %c0_12 = arith.constant 0 : index
    %15 = vector.load %arg4[%c0_11, %c0_12] : memref<1x128xf32, #tpu.memory_space<vmem>>, vector<1x128xf32>
    %16 = vector.broadcast %15 : vector<1x128xf32> to vector<2x128xf32>
    %17 = arith.addf %14, %16 : vector<2x128xf32>
    %cst_13 = arith.constant 0.000000e+00 : f32
    %18 = vector.broadcast %cst_13 : f32 to vector<2x128xf32>
    %19 = arith.maximumf %17, %18 : vector<2x128xf32>
    %20 = arith.truncf %19 : vector<2x128xf32> to vector<2x128xbf16>
    %c0_14 = arith.constant 0 : index
    %c0_15 = arith.constant 0 : index
    %21 = vector.load %arg5[%c0_14, %c0_15] : memref<128x128xbf16, #tpu.memory_space<vmem>>, vector<128x128xbf16>
    %cst_16 = arith.constant dense<0.000000e+00> : vector<2x128xf32>
    %22 = tpu.matmul %20, %21, %cst_16 {dimension_numbers = #tpu.dot_dimension_numbers<[1], [0], [0], [1], [0, 0, 1, 1], [], []>} : vector<2x128xbf16>, vector<128x128xbf16>, vector<2x128xf32> -> vector<2x128xf32>
    %c0_17 = arith.constant 0 : index
    %c0_18 = arith.constant 0 : index
    %23 = vector.load %arg6[%c0_17, %c0_18] : memref<1x128xf32, #tpu.memory_space<vmem>>, vector<1x128xf32>
    %24 = vector.broadcast %23 : vector<1x128xf32> to vector<2x128xf32>
    %25 = arith.addf %22, %24 : vector<2x128xf32>
    %c0_19 = arith.constant 0 : index
    %c0_20 = arith.constant 0 : index
    %26 = vector.load %arg7[%c0_19, %c0_20] : memref<2x128xf32, #tpu.memory_space<vmem>>, vector<2x128xf32>
    tpu.vector_store %arg7[%c0_19, %c0_20], %25 {strides = array<i32>} : memref<2x128xf32, #tpu.memory_space<vmem>>, vector<2x128xf32>,
    return
  }
}

</mosaic_0001>

<bundles_post_ra>
// kernel: tpu_custom_call.1
= control target key start
LH: loop header
LB: loop body
LE: loop exit
PB: predicated region body
PF: predicated region fallthrough
CT: control target
= control target key end

     0   :  { %12 = vsyncpa [#allocation3], 0  ;;  %s1821_s0 = inlined_call_operand.hbm [shape: bf16[512,128], index: 0, kind: input, shape index: {}]   ;;  %s1822_s1 = inlined_call_operand.hbm [shape: bf16[128,128], index: 1, kind: input, shape index: {}]   ;;  %s1823_s2 = inlined_call_operand.vmem [shape: f32[1,128], index: 2, kind: input, shape index: {}]   ;;  %s1824_s3 = inlined_call_operand.hbm [shape: bf16[128,128], index: 3, kind: input, shape index: {}]   ;;  %s1825_s4 = inlined_call_operand.vmem [shape: f32[1,128], index: 4, kind: input, shape index: {}]   ;;  %s1826_s5 = inlined_call_operand.hbm [shape: bf16[128,128], index: 5, kind: input, shape index: {}]   ;;  %s1827_s6 = inlined_call_operand.vmem [shape: f32[1,128], index: 6, kind: input, shape index: {}]   ;;  %s1828_s7 = inlined_call_operand.hbm [shape: f32[2,128], index: 7, kind: output, shape index: {}]  }
   0x1   :  { %13 = vsyncpa [#allocation6], 0 }
   0x2   :  { %14 = vsyncpa [#allocation9], 0 }
   0x3   :  { %15 = vsyncpa [#allocation4], 0  ;;  %s1527_s24 = smov [#allocation5]   ;;  %s1528_s26 = smov [#allocation2]  }
   0x4   :  { %s33_s25 = sshll.u32 %s1527_s24, 4  ;;  %s21_s27 = sshll.u32 %s1528_s26, 4  ;;  %s34_s25 = int_to_ptr.vmem [resolvable:$true] %s33_s25  ;;  %s1576_s27 = int_to_ptr.vmem [resolvable:$true] %s21_s27 }
   0x5   :  { %s1409_s30 = scalar_lea.hbm %s1822_s1, 1024 }
   0x6   :  { %p1410_p0 = scmp.ne.s32.totalorder %s1822_s1, %s1409_s30  ;;  %p1413_p1 = scmp.lt.u32.totalorder %s1409_s30, %s1822_s1 }
   0x8   :  { %p1415_p2 = pnand %p1413_p1, %p1410_p0 }
   0xa   :  { %1418 = shalt.err (!%p1415_p2)
}
   0xb   :  { %s1419_s12 = scalar_lea.vmem %s34_s25, 1024  ;;  %p1424_p4 = scmp.lt.s32.totalorder %s34_s25, %s34_s25 }
   0xc   :  { %p1420_p3 = scmp.ne.s32.totalorder %s34_s25, %s1419_s12  ;;  %p1425_p5 = scmp.lt.s32.totalorder %s1419_s12, %s1419_s12 }
   0xe   :  { %p1426_p6 = por %p1425_p5, %p1424_p4 }
  0x10   :  { %p1427_p7 = pnand %p1426_p6, %p1420_p3 }
  0x12   :  { %1430 = shalt.err (!%p1427_p7)
}
  0x13   :  { %s1529_s13 = smov 64   ;;  %s1530_s14 = smov 4  }
  0x14   :  { %39 = dma.hbm_to_vmem [thread:$0]  %s1822_s1, 1024, %s34_s25, [#allocation6], %s1529_s13, %s1529_s13, %s1530_s14  }
  0x15   :  { %s1431_s19 = scalar_lea.hbm %s1821_s0, 4096 }
  0x16   :  { %p1432_p8 = scmp.ne.s32.totalorder %s1821_s0, %s1431_s19  ;;  %p1435_p9 = scmp.lt.u32.totalorder %s1431_s19, %s1821_s0 }
  0x18   :  { %p1437_p10 = pnand %p1435_p9, %p1432_p8 }
  0x1a   :  { %1440 = shalt.err (!%p1437_p10)
}
  0x1b   :  { %s1441_s24 = scalar_lea.vmem %s1576_s27, 4096  ;;  %p1446_p12 = scmp.lt.s32.totalorder %s1576_s27, %s1576_s27 }
  0x1c   :  { %p1442_p11 = scmp.ne.s32.totalorder %s1576_s27, %s1441_s24  ;;  %p1447_p13 = scmp.lt.s32.totalorder %s1441_s24, %s1441_s24 }
  0x1e   :  { %p1448_p0 = por %p1447_p13, %p1446_p12 }
  0x20   :  { %p1449_p1 = pnand %p1448_p0, %p1442_p11 }
  0x22   :  { %1452 = shalt.err (!%p1449_p1)
}
  0x23   :  { %27 = dma.hbm_to_vmem [thread:$0]  %s1821_s0, 4096, %s1576_s27, [#allocation3], %s1529_s13, %s1529_s13, %s1530_s14  }
  0x24   :  { %s1531_s26 = smov [#allocation7]   ;;  %s1532_s29 = smov [#allocation8]  }
  0x25   :  { %s47_s28 = sshll.u32 %s1531_s26, 4  ;;  %s61_s30 = sshll.u32 %s1532_s29, 4  ;;  %s48_s28 = int_to_ptr.vmem [resolvable:$true] %s47_s28  ;;  %s1613_s30 = int_to_ptr.vmem [resolvable:$true] %s61_s30 }
  0x26   :  { %s1453_s10 = scalar_lea.hbm %s1824_s3, 1024 }
  0x27   :  { %p1454_p2 = scmp.ne.s32.totalorder %s1824_s3, %s1453_s10  ;;  %p1457_p3 = scmp.lt.u32.totalorder %s1453_s10, %s1824_s3 }
  0x29   :  { %p1459_p4 = pnand %p1457_p3, %p1454_p2 }
  0x2b   :  { %1462 = shalt.err (!%p1459_p4)
}
  0x2c   :  { %s1463_s0 = scalar_lea.vmem %s48_s28, 1024  ;;  %p1468_p6 = scmp.lt.s32.totalorder %s48_s28, %s48_s28 }
  0x2d   :  { %p1464_p5 = scmp.ne.s32.totalorder %s48_s28, %s1463_s0  ;;  %p1469_p7 = scmp.lt.s32.totalorder %s1463_s0, %s1463_s0 }
  0x2f   :  { %p1470_p8 = por %p1469_p7, %p1468_p6 }
  0x31   :  { %p1471_p9 = pnand %p1470_p8, %p1464_p5 }
  0x33   :  { %1474 = shalt.err (!%p1471_p9)
}
  0x34   :  { %53 = dma.hbm_to_vmem [thread:$0]  %s1824_s3, 1024, %s48_s28, [#allocation6], %s1529_s13, %s1529_s13, %s1530_s14  }
  0x35   :  { %s1475_s20 = scalar_lea.hbm %s1826_s5, 1024 }
  0x36   :  { %p1476_p10 = scmp.ne.s32.totalorder %s1826_s5, %s1475_s20  ;;  %p1479_p11 = scmp.lt.u32.totalorder %s1475_s20, %s1826_s5 }
  0x38   :  { %p1481_p12 = pnand %p1479_p11, %p1476_p10 }
  0x3a   :  { %1484 = shalt.err (!%p1481_p12)
}
  0x3b   :  { %s1485_s1 = scalar_lea.vmem %s1613_s30, 1024  ;;  %p1490_p0 = scmp.lt.s32.totalorder %s1613_s30, %s1613_s30 }
  0x3c   :  { %p1486_p13 = scmp.ne.s32.totalorder %s1613_s30, %s1485_s1  ;;  %p1491_p1 = scmp.lt.s32.totalorder %s1485_s1, %s1485_s1 }
  0x3e   :  { %p1492_p2 = por %p1491_p1, %p1490_p0 }
  0x40   :  { %p1493_p3 = pnand %p1492_p2, %p1486_p13 }
  0x42   :  { %1496 = shalt.err (!%p1493_p3)
}
  0x43   :  { %67 = dma.hbm_to_vmem [thread:$0]  %s1826_s5, 1024, %s1613_s30, [#allocation9], %s1529_s13, %s1529_s13, %s1530_s14  }
  0x44   :  { %1519 = dma.done.wait [#allocation3], 4096  }
  0x45   :  { %1520 = vsyncadd [#allocation3], 4294963200 }
  0x46   :  { %1521 = dma.done.wait [#allocation6], 2048  }
  0x47   :  { %1522 = vsyncadd [#allocation6], 4294965248 }
  0x48   :  { %1523 = dma.done.wait [#allocation9], 1024  }
  0x49   :  { %1524 = vsyncadd [#allocation9], 4294966272  ;;  %v1353_v0 = vld [vmem:[#allocation5] sm:$0xff]   ;;  %v1354_v1 = vld [vmem:[#allocation5 + $0x8] sm:$0xff]   ;;  %v1533_v41 = vmov 0.0   ;;  %vm1534_vm0 = vmmov 0  }
  0x4a   :  { %1208 = vmatprep.subr.bf16.mxu0 %v1353_v0  ;;  %1328 = vmatprep.subr.bf16.mxu1 %v1353_v0  ;;  %v1355_v2 = vld [vmem:[#allocation5 + $0x10] sm:$0xff]   ;;  %v1356_v3 = vld [vmem:[#allocation5 + $0x18] sm:$0xff]   ;;  %v1361_v4 = vld [vmem:[#allocation2] sm:$0xff]   ;;  %vm868_vm1 = vcmask 1041409   ;;  %s1535_s29 = smov [#allocation10]  }
  0x4b   :  { %1209 = vmatpush3.bf16.msra.mxu0 %v1353_v0  ;;  %1336 = vmatpush3.bf16.msra.mxu1 %v1353_v0  ;;  %v1357_v5 = vld [vmem:[#allocation5 + $0x20] sm:$0xff]   ;;  %v1358_v6 = vld [vmem:[#allocation5 + $0x28] sm:$0xff]   ;;  %v1359_v7 = vld [vmem:[#allocation5 + $0x30] sm:$0xff]   ;;  %s1080_s30 = sshll.u32 %s1535_s29, 4  ;;  %s1081_s30 = int_to_ptr.vmem [resolvable:$true] %s1080_s30 }
  0x4c   :  { %1210 = vmatprep.subr.bf16.mxu0 %v1354_v1  ;;  %1329 = vmatprep.subr.bf16.mxu1 %v1354_v1  ;;  %v1360_v8 = vld [vmem:[#allocation5 + $0x38] sm:$0xff]   ;;  %v1362_v9 = vld [vmem:[#allocation2 + $0x8] sm:$0xff]   ;;  %v1363_v10 = vld [vmem:[#allocation2 + $0x10] sm:$0xff]   ;;  %p1502_p5 = scmp.lt.s32.totalorder %s1081_s30, %s1081_s30 }
  0x4d   :  { %1224 = vmatprep.mubr.bf16.mxu0 %v1361_v4  ;;  %v1383_v11 = vld [vmem:[#allocation2 + $0xb0] sm:$0xff]   ;;  %v1384_v12 = vld [vmem:[#allocation2 + $0xb8] sm:$0xff]   ;;  %v1385_v13 = vld [vmem:[#allocation2 + $0xc0] sm:$0xff]  }
  0x4e   :  { %1268 = vmatprep.mubr.bf16.mxu1 %v1383_v11  ;;  %v1364_v14 = vld [vmem:[#allocation2 + $0x18] sm:$0xff]   ;;  %v1365_v15 = vld [vmem:[#allocation2 + $0x20] sm:$0xff]   ;;  %v1386_v16 = vld [vmem:[#allocation2 + $0xc8] sm:$0xff]  }
  0x4f   :  { %1211 = vmatpush3.bf16.msra.mxu0 %v1354_v1  ;;  %1337 = vmatpush3.bf16.msra.mxu1 %v1354_v1  ;;  %v1387_v17 = vld [vmem:[#allocation2 + $0xd0] sm:$0xff]   ;;  %v1366_v18 = vld [vmem:[#allocation2 + $0x28] sm:$0xff]   ;;  %v1388_v19 = vld [vmem:[#allocation2 + $0xd8] sm:$0xff]  }
  0x50   :  { %1212 = vmatprep.subr.bf16.mxu0 %v1355_v2  ;;  %1330 = vmatprep.subr.bf16.mxu1 %v1355_v2  ;;  %v1367_v20 = vld [vmem:[#allocation2 + $0x30] sm:$0xff]   ;;  %v1389_v21 = vld [vmem:[#allocation2 + $0xe0] sm:$0xff]   ;;  %v1368_v22 = vld [vmem:[#allocation2 + $0x38] sm:$0xff]  }
  0x51   :  { %v1390_v23 = vld [vmem:[#allocation2 + $0xe8] sm:$0xff]   ;;  %v1369_v24 = vld [vmem:[#allocation2 + $0x40] sm:$0xff]   ;;  %v1391_v25 = vld [vmem:[#allocation2 + $0xf0] sm:$0xff]  }
  0x52   :  { %v1370_v26 = vld [vmem:[#allocation2 + $0x48] sm:$0xff]   ;;  %v1392_v27 = vld [vmem:[#allocation2 + $0xf8] sm:$0xff]   ;;  %v1371_v28 = vld [vmem:[#allocation2 + $0x50] sm:$0xff]  }
  0x53   :  { %1213 = vmatpush3.bf16.msra.mxu0 %v1355_v2  ;;  %1338 = vmatpush3.bf16.msra.mxu1 %v1355_v2  ;;  %v1372_v29 = vld [vmem:[#allocation2 + $0x58] sm:$0xff]   ;;  %v1373_v30 = vld [vmem:[#allocation2 + $0x60] sm:$0xff]   ;;  %v1374_v31 = vld [vmem:[#allocation2 + $0x68] sm:$0xff]  }
  0x54   :  { %1214 = vmatprep.subr.bf16.mxu0 %v1356_v3  ;;  %1331 = vmatprep.subr.bf16.mxu1 %v1356_v3  ;;  %v1375_v32 = vld [vmem:[#allocation2 + $0x70] sm:$0xff]   ;;  %v1376_v33 = vld [vmem:[#allocation2 + $0x78] sm:$0xff]   ;;  %v1377_v34 = vld [vmem:[#allocation2 + $0x80] sm:$0xff]  }
  0x55   :  { %v1378_v35 = vld [vmem:[#allocation2 + $0x88] sm:$0xff]   ;;  %v1379_v36 = vld [vmem:[#allocation2 + $0x90] sm:$0xff]   ;;  %v1380_v37 = vld [vmem:[#allocation2 + $0x98] sm:$0xff]  }
  0x56   :  { %v1381_v38 = vld [vmem:[#allocation2 + $0xa0] sm:$0xff]   ;;  %v1382_v39 = vld [vmem:[#allocation2 + $0xa8] sm:$0xff]   ;;  %v1395_v51 = vld [vmem:[#allocation7 + $0x10] sm:$0xff]  }
  0x57   :  { %1215 = vmatpush3.bf16.msra.mxu0 %v1356_v3  ;;  %1339 = vmatpush3.bf16.msra.mxu1 %v1356_v3  ;;  %v1393_v40 = vld [vmem:[#allocation7] sm:$0xff]   ;;  %v1394_v42 = vld [vmem:[#allocation7 + $0x8] sm:$0xff]   ;;  %v1396_v59 = vld [vmem:[#allocation7 + $0x18] sm:$0xff]  }
  0x58   :  { %1216 = vmatprep.subr.bf16.mxu0 %v1357_v5  ;;  %1332 = vmatprep.subr.bf16.mxu1 %v1357_v5  ;;  %v1655_v43 = vld [vmem:[%s1823_s2] ss:$0 sm:$0xff] }
  0x5b   :  { %1217 = vmatpush3.bf16.msra.mxu0 %v1357_v5  ;;  %1340 = vmatpush3.bf16.msra.mxu1 %v1357_v5 }
  0x5c   :  { %1218 = vmatprep.subr.bf16.mxu0 %v1358_v6  ;;  %1333 = vmatprep.subr.bf16.mxu1 %v1358_v6 }
  0x5f   :  { %1219 = vmatpush3.bf16.msra.mxu0 %v1358_v6  ;;  %1341 = vmatpush3.bf16.msra.mxu1 %v1358_v6 }
  0x60   :  { %1220 = vmatprep.subr.bf16.mxu0 %v1359_v7  ;;  %1334 = vmatprep.subr.bf16.mxu1 %v1359_v7 }
  0x63   :  { %1221 = vmatpush3.bf16.msra.mxu0 %v1359_v7  ;;  %1342 = vmatpush3.bf16.msra.mxu1 %v1359_v7  ;;  %v1397_v7 = vld [vmem:[#allocation7 + $0x20] sm:$0xff]  }
  0x64   :  { %1222 = vmatprep.subr.bf16.mxu0 %v1360_v8  ;;  %1335 = vmatprep.subr.bf16.mxu1 %v1360_v8 }
  0x67   :  { %1223 = vmatpush3.bf16.msra.mxu0 %v1360_v8  ;;  %1343 = vmatpush3.bf16.msra.mxu1 %v1360_v8 }
  0x68   :  { %1288 = vmatprep.subr.bf16.mxu1 %v1533_v41 }
  0x6a   :  { %1225 = vmatmul.mubr.bf16.vlgmr.msra.gmra.mrb[0].mxu0 %v1362_v9  ;;  %1269 = vmatmul.mubr.bf16.vlgmr.msra.gmra.mrb[0].mxu1 %v1384_v12 }
  0x6b   :  { %1228 = vmatprep.mubr.bf16.mxu0 %v1363_v10  ;;  %1272 = vmatprep.mubr.bf16.mxu1 %v1385_v13 }
  0x6c   :  { %1289 = vmatpush3.bf16.msra.mxu1 %v1393_v40 }
  0x6d   :  { %1290 = vmatprep.subr.bf16.mxu1 %v1533_v41 }
  0x70   :  { %1291 = vmatpush3.bf16.msra.mxu1 %v1394_v42 }
  0x71   :  { %1292 = vmatprep.subr.bf16.mxu1 %v1533_v41 }
  0x72   :  { %1229 = vmatmul.mubr.bf16.gmra.mrb[4].mxu0 %v1364_v14  ;;  %1273 = vmatmul.mubr.bf16.gmra.mrb[4].mxu1 %v1386_v16 }
  0x73   :  { %1232 = vmatprep.mubr.bf16.mxu0 %v1365_v15  ;;  %1276 = vmatprep.mubr.bf16.mxu1 %v1387_v17  ;;  %v1398_v17 = vld [vmem:[#allocation7 + $0x28] sm:$0xff]  }
  0x74   :  { %1293 = vmatpush3.bf16.msra.mxu1 %v1395_v51 }
  0x75   :  { %1294 = vmatprep.subr.bf16.mxu1 %v1533_v41 }
  0x78   :  { %1295 = vmatpush3.bf16.msra.mxu1 %v1396_v59 }
  0x79   :  { %1296 = vmatprep.subr.bf16.mxu1 %v1533_v41 }
  0x7a   :  { %1233 = vmatmul.mubr.bf16.gmra.mrb[8].mxu0 %v1366_v18  ;;  %1277 = vmatmul.mubr.bf16.gmra.mrb[8].mxu1 %v1388_v19 }
  0x7b   :  { %1236 = vmatprep.mubr.bf16.mxu0 %v1367_v20  ;;  %1280 = vmatprep.mubr.bf16.mxu1 %v1389_v21 }
  0x7c   :  { %1297 = vmatpush3.bf16.msra.mxu1 %v1397_v7 }
  0x7d   :  { %1298 = vmatprep.subr.bf16.mxu1 %v1533_v41 }
  0x80   :  { %1299 = vmatpush3.bf16.msra.mxu1 %v1398_v17 }
  0x81   :  { %1300 = vmatprep.subr.bf16.mxu1 %v1533_v41 }
  0x82   :  { %1237 = vmatmul.mubr.bf16.gmra.mrb[12].mxu0 %v1368_v22  ;;  %1281 = vmatmul.mubr.bf16.gmra.mrb[12].mxu1 %v1390_v23 }
  0x83   :  { %1240 = vmatprep.mubr.bf16.mxu0 %v1369_v24  ;;  %1284 = vmatprep.mubr.bf16.mxu1 %v1391_v25 }
  0x8a   :  { %1241 = vmatmul.mubr.bf16.gmra.mrb[16].mxu0 %v1370_v26  ;;  %1285 = vmatmul.mubr.bf16.gmra.mrb[16].mxu1 %v1392_v27 }
  0x8b   :  { %1244 = vmatprep.mubr.bf16.mxu0 %v1371_v28  ;;  %1304 = vmatprep.mubr.msk.bf16.mxu1 %vm1534_vm0, %v1533_v41 }
  0x92   :  { %1245 = vmatmul.mubr.bf16.gmra.mrb[20].mxu0 %v1372_v29  ;;  %v1399_v29 = vld [vmem:[#allocation7 + $0x30] sm:$0xff]  }
  0x93   :  { %1248 = vmatprep.mubr.bf16.mxu0 %v1373_v30  ;;  %1301 = vmatpush3.bf16.msra.mxu1 %v1399_v29 }
  0x94   :  { %1302 = vmatprep.subr.bf16.mxu1 %v1533_v41 }
  0x9a   :  { %1249 = vmatmul.mubr.bf16.gmra.mrb[24].mxu0 %v1374_v31 }
  0x9b   :  { %1252 = vmatprep.mubr.bf16.mxu0 %v1375_v32 }
  0xa2   :  { %1253 = vmatmul.mubr.bf16.gmra.mrb[28].mxu0 %v1376_v33 }
  0xa3   :  { %1256 = vmatprep.mubr.bf16.mxu0 %v1377_v34 }
  0xaa   :  { %1257 = vmatmul.mubr.bf16.gmra.mrb[32].mxu0 %v1378_v35 }
  0xab   :  { %1260 = vmatprep.mubr.bf16.mxu0 %v1379_v36 }
  0xb2   :  { %1261 = vmatmul.mubr.bf16.gmra.mrb[36].mxu0 %v1380_v37 }
  0xb3   :  { %1264 = vmatprep.mubr.bf16.mxu0 %v1381_v38 }
  0xba   :  { %1265 = vmatmul.mubr.bf16.gmra.mrb[40].mxu0 %v1382_v39  ;;  %v1400_v39 = vld [vmem:[#allocation7 + $0x38] sm:$0xff]  }
  0xbb   :  { %1303 = vmatpush3.bf16.msra.mxu1 %v1400_v39 }
  0xbc   :  { %1308 = vmatprep.subr.bf16.mxu1 %v1533_v41 }
 0x13d   :  { %v1226_v44 = vpop.f32.mrb[0].mxu0  ;;  %v1657_v45 = vpop.f32.mrb[0].mxu1 }
 0x13e   :  { %v444_v46 = vpop.f32.mrb[1].mxu0  ;;  %v1659_v47 = vpop.f32.mrb[1].mxu1  ;;  %v453_v54 = vadd.f32 %v1226_v44, %v1655_v43 }
 0x13f   :  { %v445_v48 = vadd.f32 %v1655_v43, %v444_v46  ;;  %v1227_v49 = vpop.f32.mrb[2].mxu0  ;;  %v1663_v50 = vpop.f32.mrb[2].mxu1 }
 0x140   :  { %v447_v52 = vpop.f32.mrb[3].mxu0  ;;  %v1665_v53 = vpop.f32.mrb[3].mxu1  ;;  %v456_v57 = vadd.f32 %v1227_v49, %v1655_v43  ;;  %v701_v60 = vmax.f32 %v453_v54, 0.0 }
 0x141   :  { %v448_v55 = vadd.f32 %v1655_v43, %v447_v52  ;;  %v699_v56 = vmax.f32 %v445_v48, 0.0 }
 0x142   :  { %v702_v2 = vmax.f32 %v456_v57, 0.0 }
 0x143   :  { %v700_v58 = vmax.f32 %v448_v55, 0.0 }
 0x145   :  { %v763_v61 = vadd.f32 %v700_v58, %v699_v56  ;;  %v1230_v62 = vpop.f32.mrb[4].mxu0  ;;  %v1671_v63 = vpop.f32.mrb[4].mxu1 }
 0x146   :  { %v460_v0 = vpop.f32.mrb[5].mxu0  ;;  %v1673_v1 = vpop.f32.mrb[5].mxu1  ;;  %v469_v10 = vadd.f32 %v1230_v62, %v1655_v43 }
 0x147   :  { %v764_v3 = vadd.f32 %v763_v61, %v701_v60  ;;  %v461_v4 = vadd.f32 %v1655_v43, %v460_v0  ;;  %v1231_v5 = vpop.f32.mrb[6].mxu0  ;;  %v1677_v6 = vpop.f32.mrb[6].mxu1 }
 0x148   :  { %v463_v8 = vpop.f32.mrb[7].mxu0  ;;  %v1679_v9 = vpop.f32.mrb[7].mxu1  ;;  %v472_v15 = vadd.f32 %v1231_v5, %v1655_v43  ;;  %v705_v18 = vmax.f32 %v469_v10, 0.0 }
 0x149   :  { %v703_v11 = vmax.f32 %v461_v4, 0.0  ;;  %v765_v12 = vadd.f32 %v764_v3, %v702_v2  ;;  %v464_v13 = vadd.f32 %v1655_v43, %v463_v8 }
 0x14a   :  { %v706_v24 = vmax.f32 %v472_v15, 0.0 }
 0x14b   :  { %v766_v14 = vadd.f32 %v765_v12, %v703_v11  ;;  %v704_v16 = vmax.f32 %v464_v13, 0.0 }
 0x14d   :  { %v767_v19 = vadd.f32 %v766_v14, %v704_v16  ;;  %v1234_v20 = vpop.f32.mrb[8].mxu0  ;;  %v1685_v21 = vpop.f32.mrb[8].mxu1 }
 0x14e   :  { %v476_v22 = vpop.f32.mrb[9].mxu0  ;;  %v1687_v23 = vpop.f32.mrb[9].mxu1  ;;  %v485_v32 = vadd.f32 %v1234_v20, %v1655_v43 }
 0x14f   :  { %v768_v25 = vadd.f32 %v767_v19, %v705_v18  ;;  %v477_v26 = vadd.f32 %v1655_v43, %v476_v22  ;;  %v1235_v27 = vpop.f32.mrb[10].mxu0  ;;  %v1691_v28 = vpop.f32.mrb[10].mxu1 }
 0x150   :  { %v479_v30 = vpop.f32.mrb[11].mxu0  ;;  %v1693_v31 = vpop.f32.mrb[11].mxu1  ;;  %v488_v37 = vadd.f32 %v1235_v27, %v1655_v43  ;;  %v709_v40 = vmax.f32 %v485_v32, 0.0 }
 0x151   :  { %v707_v33 = vmax.f32 %v477_v26, 0.0  ;;  %v769_v34 = vadd.f32 %v768_v25, %v706_v24  ;;  %v480_v35 = vadd.f32 %v1655_v43, %v479_v30 }
 0x152   :  { %v710_v51 = vmax.f32 %v488_v37, 0.0 }
 0x153   :  { %v770_v36 = vadd.f32 %v769_v34, %v707_v33  ;;  %v708_v38 = vmax.f32 %v480_v35, 0.0 }
 0x155   :  { %v771_v42 = vadd.f32 %v770_v36, %v708_v38  ;;  %v1238_v44 = vpop.f32.mrb[12].mxu0  ;;  %v1701_v46 = vpop.f32.mrb[12].mxu1 }
 0x156   :  { %v492_v48 = vpop.f32.mrb[13].mxu0  ;;  %v1703_v49 = vpop.f32.mrb[13].mxu1  ;;  %v501_v59 = vadd.f32 %v1238_v44, %v1655_v43 }
 0x157   :  { %v772_v52 = vadd.f32 %v771_v42, %v709_v40  ;;  %v493_v54 = vadd.f32 %v1655_v43, %v492_v48  ;;  %v1239_v55 = vpop.f32.mrb[14].mxu0  ;;  %v1707_v56 = vpop.f32.mrb[14].mxu1 }
 0x158   :  { %v495_v57 = vpop.f32.mrb[15].mxu0  ;;  %v1709_v58 = vpop.f32.mrb[15].mxu1  ;;  %v504_v2 = vadd.f32 %v1239_v55, %v1655_v43  ;;  %v713_v4 = vmax.f32 %v501_v59, 0.0 }
 0x159   :  { %v711_v60 = vmax.f32 %v493_v54, 0.0  ;;  %v773_v61 = vadd.f32 %v772_v52, %v710_v51  ;;  %v496_v62 = vadd.f32 %v1655_v43, %v495_v57 }
 0x15a   :  { %v714_v12 = vmax.f32 %v504_v2, 0.0 }
 0x15b   :  { %v774_v0 = vadd.f32 %v773_v61, %v711_v60  ;;  %v712_v3 = vmax.f32 %v496_v62, 0.0 }
 0x15d   :  { %v775_v5 = vadd.f32 %v774_v0, %v712_v3  ;;  %v1242_v7 = vpop.f32.mrb[16].mxu0  ;;  %v1714_v8 = vpop.f32.mrb[16].mxu1 }
 0x15e   :  { %v508_v10 = vpop.f32.mrb[17].mxu0  ;;  %v1716_v11 = vpop.f32.mrb[17].mxu1  ;;  %v517_v19 = vadd.f32 %v1242_v7, %v1655_v43 }
 0x15f   :  { %v776_v13 = vadd.f32 %v775_v5, %v713_v4  ;;  %v509_v14 = vadd.f32 %v1655_v43, %v508_v10  ;;  %v1243_v15 = vpop.f32.mrb[18].mxu0  ;;  %v1719_v16 = vpop.f32.mrb[18].mxu1 }
 0x160   :  { %v511_v17 = vpop.f32.mrb[19].mxu0  ;;  %v1721_v18 = vpop.f32.mrb[19].mxu1  ;;  %v520_v26 = vadd.f32 %v1243_v15, %v1655_v43  ;;  %v717_v29 = vmax.f32 %v517_v19, 0.0 }
 0x161   :  { %v715_v20 = vmax.f32 %v509_v14, 0.0  ;;  %v777_v22 = vadd.f32 %v776_v13, %v714_v12  ;;  %v512_v24 = vadd.f32 %v1655_v43, %v511_v17 }
 0x162   :  { %v718_v34 = vmax.f32 %v520_v26, 0.0 }
 0x163   :  { %v778_v25 = vadd.f32 %v777_v22, %v715_v20  ;;  %v716_v27 = vmax.f32 %v512_v24, 0.0 }
 0x165   :  { %v779_v30 = vadd.f32 %v778_v25, %v716_v27  ;;  %v1246_v32 = vpop.f32.mrb[20].mxu0 }
 0x166   :  { %v524_v33 = vpop.f32.mrb[21].mxu0  ;;  %v533_v39 = vadd.f32 %v1246_v32, %v1655_v43 }
 0x167   :  { %v780_v35 = vadd.f32 %v779_v30, %v717_v29  ;;  %v525_v36 = vadd.f32 %v1655_v43, %v524_v33  ;;  %v1247_v37 = vpop.f32.mrb[22].mxu0 }
 0x168   :  { %v527_v38 = vpop.f32.mrb[23].mxu0  ;;  %v536_v51 = vadd.f32 %v1247_v37, %v1655_v43  ;;  %v721_v54 = vmax.f32 %v533_v39, 0.0 }
 0x169   :  { %v719_v40 = vmax.f32 %v525_v36, 0.0  ;;  %v781_v42 = vadd.f32 %v780_v35, %v718_v34  ;;  %v528_v44 = vadd.f32 %v1655_v43, %v527_v38 }
 0x16a   :  { %v722_v60 = vmax.f32 %v536_v51, 0.0 }
 0x16b   :  { %v782_v48 = vadd.f32 %v781_v42, %v719_v40  ;;  %v720_v52 = vmax.f32 %v528_v44, 0.0 }
 0x16d   :  { %v783_v55 = vadd.f32 %v782_v48, %v720_v52  ;;  %v1250_v57 = vpop.f32.mrb[24].mxu0 }
 0x16e   :  { %v540_v59 = vpop.f32.mrb[25].mxu0  ;;  %v549_v3 = vadd.f32 %v1250_v57, %v1655_v43 }
 0x16f   :  { %v784_v61 = vadd.f32 %v783_v55, %v721_v54  ;;  %v541_v62 = vadd.f32 %v1655_v43, %v540_v59  ;;  %v1251_v0 = vpop.f32.mrb[26].mxu0 }
 0x170   :  { %v543_v2 = vpop.f32.mrb[27].mxu0  ;;  %v552_v12 = vadd.f32 %v1251_v0, %v1655_v43  ;;  %v725_v14 = vmax.f32 %v549_v3, 0.0 }
 0x171   :  { %v723_v4 = vmax.f32 %v541_v62, 0.0  ;;  %v785_v5 = vadd.f32 %v784_v61, %v722_v60  ;;  %v544_v7 = vadd.f32 %v1655_v43, %v543_v2 }
 0x172   :  { %v726_v20 = vmax.f32 %v552_v12, 0.0 }
 0x173   :  { %v786_v10 = vadd.f32 %v785_v5, %v723_v4  ;;  %v724_v13 = vmax.f32 %v544_v7, 0.0 }
 0x175   :  { %v787_v15 = vadd.f32 %v786_v10, %v724_v13  ;;  %v1254_v17 = vpop.f32.mrb[28].mxu0 }
 0x176   :  { %v556_v19 = vpop.f32.mrb[29].mxu0  ;;  %v565_v27 = vadd.f32 %v1254_v17, %v1655_v43 }
 0x177   :  { %v788_v22 = vadd.f32 %v787_v15, %v725_v14  ;;  %v557_v24 = vadd.f32 %v1655_v43, %v556_v19  ;;  %v1255_v25 = vpop.f32.mrb[30].mxu0 }
 0x178   :  { %v559_v26 = vpop.f32.mrb[31].mxu0  ;;  %v568_v34 = vadd.f32 %v1255_v25, %v1655_v43  ;;  %v729_v36 = vmax.f32 %v565_v27, 0.0 }
 0x179   :  { %v727_v29 = vmax.f32 %v557_v24, 0.0  ;;  %v789_v30 = vadd.f32 %v788_v22, %v726_v20  ;;  %v560_v32 = vadd.f32 %v1655_v43, %v559_v26 }
 0x17a   :  { %v730_v40 = vmax.f32 %v568_v34, 0.0 }
 0x17b   :  { %v790_v33 = vadd.f32 %v789_v30, %v727_v29  ;;  %v728_v35 = vmax.f32 %v560_v32, 0.0 }
 0x17d   :  { %v791_v37 = vadd.f32 %v790_v33, %v728_v35  ;;  %v1258_v38 = vpop.f32.mrb[32].mxu0 }
 0x17e   :  { %v572_v39 = vpop.f32.mrb[33].mxu0  ;;  %v581_v54 = vadd.f32 %v1258_v38, %v1655_v43 }
 0x17f   :  { %v792_v42 = vadd.f32 %v791_v37, %v729_v36  ;;  %v573_v44 = vadd.f32 %v1655_v43, %v572_v39  ;;  %v1259_v48 = vpop.f32.mrb[34].mxu0 }
 0x180   :  { %v575_v51 = vpop.f32.mrb[35].mxu0  ;;  %v584_v59 = vadd.f32 %v1259_v48, %v1655_v43  ;;  %v733_v61 = vmax.f32 %v581_v54, 0.0 }
 0x181   :  { %v1739_v52 = vadd.f32 %v792_v42, %v730_v40  ;;  %v576_v55 = vadd.f32 %v1655_v43, %v575_v51  ;;  %v731_v57 = vmax.f32 %v573_v44, 0.0  ;;  %v621_v42 = vadd.f32 %v1655_v43, %v1659_v47 }
 0x182   :  { %v734_v3 = vmax.f32 %v584_v59, 0.0  ;;  %v629_v59 = vadd.f32 %v1657_v45, %v1655_v43  ;;  %v637_v47 = vadd.f32 %v1655_v43, %v1673_v1  ;;  %v645_v45 = vadd.f32 %v1671_v63, %v1655_v43 }
 0x183   :  { %v732_v60 = vmax.f32 %v576_v55, 0.0  ;;  %v743_v55 = vmax.f32 %v621_v42, 0.0  ;;  %v653_v1 = vadd.f32 %v1655_v43, %v1687_v23  ;;  %v661_v63 = vadd.f32 %v1685_v21, %v1655_v43 }
 0x184   :  { %v669_v23 = vadd.f32 %v1655_v43, %v1703_v49  ;;  %v677_v21 = vadd.f32 %v1701_v46, %v1655_v43  ;;  %v685_v49 = vadd.f32 %v1655_v43, %v1716_v11  ;;  %v688_v46 = vadd.f32 %v1655_v43, %v1721_v18 }
 0x185   :  { %v800_v62 = vadd.f32 %v732_v60, %v731_v57  ;;  %v1262_v0 = vpop.f32.mrb[36].mxu0  ;;  %v624_v57 = vadd.f32 %v1655_v43, %v1665_v53  ;;  %v640_v53 = vadd.f32 %v1655_v43, %v1679_v9  ;;  %v656_v9 = vadd.f32 %v1655_v43, %v1693_v31 }
 0x186   :  { %v588_v2 = vpop.f32.mrb[37].mxu0  ;;  %v597_v12 = vadd.f32 %v1262_v0, %v1655_v43  ;;  %v672_v31 = vadd.f32 %v1655_v43, %v1709_v58  ;;  %v759_v42 = vmax.f32 %v685_v49, 0.0  ;;  %v760_v11 = vmax.f32 %v688_v46, 0.0 }
 0x187   :  { %v801_v4 = vadd.f32 %v800_v62, %v733_v61  ;;  %v589_v5 = vadd.f32 %v1655_v43, %v588_v2  ;;  %v1263_v7 = vpop.f32.mrb[38].mxu0  ;;  %v632_v62 = vadd.f32 %v1663_v50, %v1655_v43  ;;  %v744_v0 = vmax.f32 %v624_v57, 0.0 }
 0x188   :  { %v591_v10 = vpop.f32.mrb[39].mxu0  ;;  %v600_v19 = vadd.f32 %v1263_v7, %v1655_v43  ;;  %v737_v22 = vmax.f32 %v597_v12, 0.0  ;;  %v745_v2 = vmax.f32 %v629_v59, 0.0  ;;  %v747_v7 = vmax.f32 %v637_v47, 0.0 }
 0x189   :  { %v735_v13 = vmax.f32 %v589_v5, 0.0  ;;  %v802_v14 = vadd.f32 %v801_v4, %v734_v3  ;;  %v592_v15 = vadd.f32 %v1655_v43, %v591_v10  ;;  %v746_v4 = vmax.f32 %v632_v62, 0.0 }
 0x18a   :  { %v738_v27 = vmax.f32 %v600_v19, 0.0  ;;  %v648_v50 = vadd.f32 %v1677_v6, %v1655_v43  ;;  %v664_v6 = vadd.f32 %v1691_v28, %v1655_v43  ;;  %v794_v28 = vrot.slane %v1739_v52, 4 }
 0x18b   :  { %v803_v17 = vadd.f32 %v802_v14, %v735_v13  ;;  %v736_v20 = vmax.f32 %v592_v15, 0.0  ;;  %v748_v13 = vmax.f32 %v640_v53, 0.0  ;;  %v749_v14 = vmax.f32 %v645_v45, 0.0 }
 0x18d   :  { %v804_v24 = vadd.f32 %v803_v17, %v736_v20  ;;  %v1266_v25 = vpop.f32.mrb[40].mxu0  ;;  %v750_v17 = vmax.f32 %v648_v50, 0.0  ;;  %v751_v20 = vmax.f32 %v653_v1, 0.0  ;;  %v1403_v1 = vld [vmem:[#allocation8 + $0x10] sm:$0xff]  }
 0x18e   :  { %v604_v26 = vpop.f32.mrb[41].mxu0  ;;  %v613_v34 = vadd.f32 %v1266_v25, %v1655_v43  ;;  %v752_v25 = vmax.f32 %v656_v9, 0.0  ;;  %v1132_v9 = vld [vmem:[%s1825_s4] ss:$0 sm:$0xff]  ;;  %s1497_s4 = scalar_lea.vmem %s1081_s30, 32 }
 0x18f   :  { %v805_v29 = vadd.f32 %v804_v24, %v737_v22  ;;  %v605_v30 = vadd.f32 %v1655_v43, %v604_v26  ;;  %v1267_v32 = vpop.f32.mrb[42].mxu0  ;;  %v753_v26 = vmax.f32 %v661_v63, 0.0  ;;  %p1498_p4 = scmp.ne.s32.totalorder %s1081_s30, %s1497_s4  ;;  %p1503_p6 = scmp.lt.s32.totalorder %s1497_s4, %s1497_s4 }
 0x190   :  { %v607_v33 = vpop.f32.mrb[43].mxu0  ;;  %v616_v39 = vadd.f32 %v1267_v32, %v1655_v43  ;;  %v741_v44 = vmax.f32 %v613_v34, 0.0  ;;  %v755_v32 = vmax.f32 %v669_v23, 0.0  ;;  %v680_v34 = vadd.f32 %v1707_v56, %v1655_v43 }
 0x191   :  { %v739_v35 = vmax.f32 %v605_v30, 0.0  ;;  %v806_v36 = vadd.f32 %v805_v29, %v738_v27  ;;  %v608_v37 = vadd.f32 %v1655_v43, %v607_v33  ;;  %v754_v29 = vmax.f32 %v664_v6, 0.0  ;;  %p1504_p7 = por %p1503_p6, %p1502_p5 }
 0x192   :  { %v742_v51 = vmax.f32 %v616_v39, 0.0  ;;  %v758_v39 = vmax.f32 %v680_v34, 0.0  ;;  %v693_v56 = vadd.f32 %v1714_v8, %v1655_v43 }
 0x193   :  { %v807_v38 = vadd.f32 %v806_v36, %v739_v35  ;;  %v740_v40 = vmax.f32 %v608_v37, 0.0  ;;  %v756_v36 = vmax.f32 %v672_v31, 0.0  ;;  %v757_v37 = vmax.f32 %v677_v21, 0.0  ;;  %p1505_p8 = pnand %p1504_p7, %p1498_p4 }
 0x195   :  { %v808_v48 = vadd.f32 %v807_v38, %v740_v40  ;;  %v795_v40 = vadd.f32 %v794_v28, %v1739_v52 }
 0x197   :  { %v809_v54 = vadd.f32 %v808_v48, %v741_v44  ;;  %v796_v48 = vrot.slane %v795_v40, 2 }
 0x199   :  { %v810_v60 = vadd.f32 %v809_v54, %v742_v51  ;;  %v696_v54 = vadd.f32 %v1719_v16, %v1655_v43  ;;  %v797_v59 = vadd.f32 %v796_v48, %v795_v40 }
 0x19b   :  { %v811_v61 = vadd.f32 %v810_v60, %v743_v55  ;;  %v761_v55 = vmax.f32 %v693_v56, 0.0  ;;  %v762_v60 = vmax.f32 %v696_v54, 0.0  ;;  %v798_v62 = vrot.slane %v797_v59, 1 }
 0x19d   :  { %v812_v3 = vadd.f32 %v811_v61, %v744_v0  ;;  %v799_v18 = vadd.f32 %v798_v62, %v797_v59 }
 0x19f   :  { %v813_v5 = vadd.f32 %v812_v3, %v745_v2  ;;  %v837_v8 = vmul.f32 0.00390625, %v799_v18 }
 0x1a1   :  { %v814_v10 = vadd.f32 %v813_v5, %v746_v4 }
 0x1a3   :  { %v815_v12 = vadd.f32 %v814_v10, %v747_v7  ;;  %v839_v7 = vpack.c.bf16 %v837_v8, %v837_v8 }
 0x1a5   :  { %v816_v15 = vadd.f32 %v815_v12, %v748_v13  ;;  %v866_v43 = vunpack.c.l.b16 %v839_v7  ;;  %v1401_v12 = vld [vmem:[#allocation8] sm:$0xff]   ;;  %v1402_v13 = vld [vmem:[#allocation8 + $0x8] sm:$0xff]  }
 0x1a7   :  { %v817_v19 = vadd.f32 %v816_v15, %v749_v14  ;;  %v1404_v14 = vld [vmem:[#allocation8 + $0x18] sm:$0xff]   ;;  %v1405_v15 = vld [vmem:[#allocation8 + $0x20] sm:$0xff]  }
 0x1a9   :  { %v818_v22 = vadd.f32 %v817_v19, %v750_v17  ;;  %v1406_v17 = vld [vmem:[#allocation8 + $0x28] sm:$0xff]   ;;  %v1407_v19 = vld [vmem:[#allocation8 + $0x30] sm:$0xff]  }
 0x1ab   :  { %v819_v24 = vadd.f32 %v818_v22, %v751_v20  ;;  %v1408_v20 = vld [vmem:[#allocation8 + $0x38] sm:$0xff]  }
 0x1ad   :  { %v820_v27 = vadd.f32 %v819_v24, %v752_v25 }
 0x1af   :  { %v821_v30 = vadd.f32 %v820_v27, %v753_v26  ;;  %v1141_v27 = vld [vmem:[%s1827_s6] ss:$0 sm:$0xff] }
 0x1b1   :  { %v822_v33 = vadd.f32 %v821_v30, %v754_v29 }
 0x1b3   :  { %v823_v35 = vadd.f32 %v822_v33, %v755_v32 }
 0x1b5   :  { %v824_v38 = vadd.f32 %v823_v35, %v756_v36 }
 0x1b7   :  { %v825_v58 = vadd.f32 %v824_v38, %v757_v37 }
 0x1b9   :  { %v826_v44 = vadd.f32 %v825_v58, %v758_v39 }
 0x1bb   :  { %v827_v51 = vadd.f32 %v826_v44, %v759_v42 }
 0x1bd   :  { %v828_v57 = vadd.f32 %v827_v51, %v760_v11 }
 0x1bf   :  { %v829_v52 = vadd.f32 %v828_v57, %v761_v55 }
 0x1c1   :  { %v830_v61 = vadd.f32 %v829_v52, %v762_v60 }
 0x1c3   :  { %v831_v0 = vrot.slane %v830_v61, 4 }
 0x1c5   :  { %v832_v47 = vadd.f32 %v831_v0, %v830_v61 }
 0x1c7   :  { %v833_v2 = vrot.slane %v832_v47, 2 }
 0x1c9   :  { %v834_v3 = vadd.f32 %v833_v2, %v832_v47 }
 0x1cb   :  { %v835_v4 = vrot.slane %v834_v3, 1 }
 0x1cd   :  { %v836_v5 = vadd.f32 %v835_v4, %v834_v3 }
 0x1cf   :  { %v838_v53 = vmul.f32 0.00390625, %v836_v5 }
 0x1d1   :  { %v840_v45 = vpack.c.bf16 %v838_v53, %v838_v53 }
 0x1d3   :  { %v867_v16 = vunpack.c.l.b16 %v840_v45 }
 0x1d5   :  { %v869_v10 = vsel %vm868_vm1, %v867_v16, %v866_v43 }
 0x1d6   :  { %v870_v50 = vpack.c.b16 %v869_v10, %v869_v10 }
 0x1d8   :  { %1305 = vmatmul.mubr.bf16.vlgmr.msra.gmra.mrb[20].mxu1 %v870_v50 }
 0x1d9   :  { %1309 = vmatpush3.bf16.msra.mxu1 %v1401_v12  ;;  %1324 = vmatprep.mubr.msk.bf16.mxu1 %vm1534_vm0, %v1533_v41 }
 0x1da   :  { %1310 = vmatprep.subr.bf16.mxu1 %v1533_v41 }
 0x1dd   :  { %1311 = vmatpush3.bf16.msra.mxu1 %v1402_v13 }
 0x1de   :  { %1312 = vmatprep.subr.bf16.mxu1 %v1533_v41 }
 0x1e1   :  { %1313 = vmatpush3.bf16.msra.mxu1 %v1403_v1 }
 0x1e2   :  { %1314 = vmatprep.subr.bf16.mxu1 %v1533_v41 }
 0x1e5   :  { %1315 = vmatpush3.bf16.msra.mxu1 %v1404_v14 }
 0x1e6   :  { %1316 = vmatprep.subr.bf16.mxu1 %v1533_v41 }
 0x1e9   :  { %1317 = vmatpush3.bf16.msra.mxu1 %v1405_v15 }
 0x1ea   :  { %1318 = vmatprep.subr.bf16.mxu1 %v1533_v41 }
 0x1ed   :  { %1319 = vmatpush3.bf16.msra.mxu1 %v1406_v17 }
 0x1ee   :  { %1320 = vmatprep.subr.bf16.mxu1 %v1533_v41 }
 0x1f1   :  { %1321 = vmatpush3.bf16.msra.mxu1 %v1407_v19 }
 0x1f2   :  { %1322 = vmatprep.subr.bf16.mxu1 %v1533_v41 }
 0x1f5   :  { %1323 = vmatpush3.bf16.msra.mxu1 %v1408_v20 }
 0x2ab   :  { %v954_v63 = vpop.f32.mrb[20].mxu1 }
 0x2ac   :  { %v955_v22 = vadd.f32 %v1132_v9, %v954_v63  ;;  %v1306_v24 = vpop.f32.mrb[21].mxu1 }
 0x2ad   :  { %v957_v6 = vpop.f32.mrb[22].mxu1 }
 0x2ae   :  { %v960_v25 = vmax.f32 %v955_v22, 0.0  ;;  %v1307_v23 = vpop.f32.mrb[23].mxu1 }
 0x2b0   :  { %v961_v26 = vpack.c.bf16 %v960_v25, %v960_v25 }
 0x2b2   :  { %1325 = vmatmul.mubr.bf16.vlgmr.msra.gmra.mrb[24].mxu1 %v961_v26 }
 0x385   :  { %v1067_v41 = vpop.f32.mrb[24].mxu1 }
 0x386   :  { %v1068_v29 = vadd.f32 %v1141_v27, %v1067_v41  ;;  %v1326_v30 = vpop.f32.mrb[25].mxu1 }
 0x387   :  { %v1070_v32 = vpop.f32.mrb[26].mxu1 }
 0x388   :  { %1073 = vst [vmem:[#allocation10] sm:$0x3] %v1068_v29  ;;  %v1327_v31 = vpop.f32.mrb[27].mxu1 }
 0x389   :  { %1508 = shalt.err (!%p1505_p8)
}
 0x38a   :  { %s1509_s6 = scalar_lea.hbm %s1828_s7, 32 }
 0x38b   :  { %p1510_p9 = scmp.ne.s32.totalorder %s1828_s7, %s1509_s6  ;;  %p1513_p10 = scmp.lt.u32.totalorder %s1509_s6, %s1828_s7 }
 0x38d   :  { %p1515_p11 = pnand %p1513_p10, %p1510_p9 }
 0x38f   :  { %1518 = shalt.err (!%p1515_p11)
}
 0x390   :  { %1083 = dma.vmem_to_hbm [thread:$0]  %s1081_s30, 32, %s1828_s7, [#allocation4]  }
 0x391   :  { %1525 = dma.done.wait [#allocation4], 32  }
 0x392   :  { %1526 = vsyncadd [#allocation4], 4294967264 }
 0x393   :  { %1087 = vsyncpa [#allocation3], 1 }
 0x394   :  { %1088 = vsyncpa [#allocation6], 1 }
 0x395   :  { %1089 = vsyncpa [#allocation9], 1 }
 0x396   :  { %1090 = vsyncpa [#allocation4], 1 }

</bundles_post_ra>
